<compile_context>
chip_gen: v5e
topology: v5e:2x2
jax: 0.10.0
libtpu: 0.0.40
codegen_flags: <defaults>
</compile_context>

<pallas_src>
import math
import functools

import numpy as np
import jax
import jax.numpy as jnp
from jax import lax
from jax.experimental import pallas as pl
from jax.experimental.pallas import tpu as pltpu


# ----------------------------------------------------------------------------
# Kernel 1: sparsity measure  M[b, h, q] = max_s(Q K_s^T) - sum_s(Q K_s^T)/L_K
# Blocks: q (GB, L_Q, H*D), k_sample (GB, S, H*D)  ->  M (GB, H, L_Q)
# ----------------------------------------------------------------------------
def _measure_kernel(q_ref, ks_ref, m_ref, *, n_heads, head_dim, inv_l_k):
    gb = q_ref.shape[0]
    # Static loops: lane-dim slices need static offsets (h * head_dim).
    for b in range(gb):
        for h in range(n_heads):
            lo = h * head_dim
            q_h = q_ref[b, :, lo:lo + head_dim].astype(jnp.bfloat16)    # (L_Q, D)
            ks_h = ks_ref[b, :, lo:lo + head_dim].astype(jnp.bfloat16)  # (S, D)
            # Compute (S, L_Q) so reductions run over sublanes and the result
            # stays lane-major for the (1, L_Q) row store (no relayout).
            s = lax.dot_general(ks_h, q_h, (((1,), (1,)), ((), ())),
                                preferred_element_type=jnp.float32)     # (S, L_Q)
            m_row = jnp.max(s, axis=0) - jnp.sum(s, axis=0) * inv_l_k   # (L_Q,)
            m_ref[b, h:h + 1, :] = m_row[None, :]


# ----------------------------------------------------------------------------
# Kernel 2: scores_top + ProbMask + softmax + blocked cumsum context + fused
# scatter.  One (batch, head-group) tile per grid step.
#   qr_ref  : (1, u,   GH*D)  gathered top-u queries
#   k_ref   : (1, L_K, GH*D)
#   v_ref   : (1, L_V, GH*D)
#   idxc_ref: (1, GH, u, 1) int32   top-u indices (column form, for the mask)
#   idxr_ref: (1, GH, 1, u) int32   top-u indices (row form, for the scatter)
#   ctx_ref : (1, L_Q, GH*D)
# ----------------------------------------------------------------------------
def _context_kernel(qr_ref, k_ref, v_ref, idxc_ref, idxr_ref, ctx_ref, *,
                    scale, n_heads, head_dim, row_blocks):
    u = qr_ref.shape[1]
    l_k = k_ref.shape[1]
    D = head_dim

    cols_k = lax.broadcasted_iota(jnp.int32, (u, l_k), 1)
    neg_big = jnp.float32(-1e30)

    # --- phase 1: attention update for the selected (top-u) queries ----------
    # Static head loop (lane slices need static offsets); only the tiny bf16
    # (u, D) updates persist into phase 2, keeping the live set bounded.
    upds, idx_rows = [], []
    for h in range(n_heads):
        lo = h * D
        q_red = qr_ref[0, :, lo:lo + D].astype(jnp.bfloat16)            # (u, D)
        k_h = k_ref[0, :, lo:lo + D].astype(jnp.bfloat16)               # (L_K, D)
        v_h = v_ref[0, :, lo:lo + D].astype(jnp.bfloat16)               # (L_V, D)
        idx_c = idxc_ref[0, h]                                          # (u, 1)
        idx_rows.append(idxr_ref[0, h])                                 # (1, u)

        s = lax.dot_general(q_red, k_h, (((1,), (1,)), ((), ())),
                            preferred_element_type=jnp.float32) * scale  # (u, L_K)
        s = jnp.where(cols_k > idx_c, neg_big, s)                        # ProbMask
        p = jnp.exp(s - jnp.max(s, axis=-1, keepdims=True))
        # exact reciprocal: off the MXU critical path, closer to the reference
        attn = p * pl.reciprocal(jnp.sum(p, axis=-1, keepdims=True), approx=False)
        upd = jnp.dot(attn.astype(jnp.bfloat16), v_h,
                      preferred_element_type=jnp.float32)                # (u, D)
        # bf16 so the one-hot scatter matmul below runs as a bf16 MXU pass.
        upds.append(upd.astype(jnp.bfloat16))

    # --- phase 2: blocked cumsum(V) + fused one-hot scatter, streamed out ----
    tril_cache = {}

    def tril(n):
        if n not in tril_cache:
            r = lax.broadcasted_iota(jnp.int32, (n, n), 0)
            c = lax.broadcasted_iota(jnp.int32, (n, n), 1)
            tril_cache[n] = (r >= c).astype(jnp.bfloat16)
        return tril_cache[n]

    carries = [jnp.zeros((1, D), jnp.float32) for _ in range(n_heads)]
    for start, rows in row_blocks:                        # static block schedule
        row_ids = start + lax.broadcasted_iota(jnp.int32, (rows, u), 0)
        parts = []
        for h in range(n_heads):
            lo = h * D
            vb32 = v_ref[0, start:start + rows, lo:lo + D].astype(jnp.float32)
            vb = vb32.astype(jnp.bfloat16)                               # (rows, D)
            blk = jnp.dot(tril(rows), vb,
                          preferred_element_type=jnp.float32) + carries[h]
            # lax.top_k indices are unique, so hit rows sum to exactly 0 or 1.
            hit = (row_ids == idx_rows[h])                               # (rows, u)
            p_hot = hit.astype(jnp.bfloat16)
            rsel = jnp.sum(hit.astype(jnp.float32), axis=-1, keepdims=True)
            blk = blk * (1.0 - rsel) + jnp.dot(p_hot, upds[h],
                                               preferred_element_type=jnp.float32)
            parts.append(blk)
            carries[h] = carries[h] + jnp.sum(vb32, axis=0, keepdims=True)
        out_blk = parts[0] if n_heads == 1 else jnp.concatenate(parts, axis=-1)
        ctx_ref[0, start:start + rows, :] = out_blk.astype(ctx_ref.dtype)


# ----------------------------------------------------------------------------
# Helpers: VMEM sizing, row-block schedule, group sizing.
# ----------------------------------------------------------------------------
def _vmem_limit_bytes():
    cap = 64 << 20                                  # conservative fallback (v7x)
    try:
        cap = int(pltpu.get_tpu_info().vmem_capacity_bytes)
    except Exception:
        pass
    # ~96 MiB on 128-MiB parts (v5e/v6e), ~48 MiB on 64-MiB parts (v7x).
    return int(max(32 << 20, min((cap * 3) // 4, cap - (16 << 20))))


def _preferred_row_block():
    # 256 matches the 2x256^2 MXU on v6e/v7x; v5e's 4x128^2 prefers 128.
    try:
        kind = jax.devices()[0].device_kind.lower()
        if "v5" in kind and ("lite" in kind or "5e" in kind):
            return 128
    except Exception:
        pass
    return 256


def _row_blocks(l_v, pref):
    # Fixed-size blocks with a (possibly ragged) tail -- never a quadratic
    # full-length tril for awkward L_V.
    r = max(1, min(pref, l_v))
    blocks, start = [], 0
    while start < l_v:
        size = min(r, l_v - start)
        blocks.append((start, size))
        start += size
    return tuple(blocks)


def _pick_batch_group(batch, per_batch_bytes, budget):
    gb = 1
    for d in range(batch, 0, -1):
        if batch % d:
            continue
        if 2 * d * per_batch_bytes <= budget and (batch // d >= 2 or d == 1):
            gb = d
            break
    return gb


def _pick_head_group(n_heads, head_dim, batch, per_head_bytes, budget):
    # Admissible group sizes divide H and give a lane width that is either the
    # full H*D or a multiple of 128 (BlockSpec minor-dim constraint).
    cands = [d for d in range(n_heads, 0, -1)
             if n_heads % d == 0 and (d == n_heads or (d * head_dim) % 128 == 0)]
    gh = cands[-1]
    for d in cands:                               # largest that fits the budget
        if 2 * d * per_head_bytes <= budget:
            gh = d
            break
    for d in cands:                               # keep grid >= 2 (v7x megacore)
        if d <= gh and batch * (n_heads // d) >= 2:
            gh = d
            break
    return gh


# ----------------------------------------------------------------------------
# Plain-JAX wrapper: free reshapes, sampling, top-k selection, tiny gathers.
# ----------------------------------------------------------------------------
def prob_attention_forward(queries, keys, values, attn_mask=None, *,
                           factor=5, scale=None, sample_key=None):
    del attn_mask  # mask_flag=True builds the ProbMask internally
    B, L_Q, H, D = queries.shape
    _, L_K, _, _ = keys.shape
    _, L_V, _, _ = values.shape
    assert L_Q == L_V, "mask_flag=True requires L_Q == L_V"
    HD = H * D

    # Free reshapes only (contiguous trailing-dim merge), no transpose/cast copies.
    q3 = queries.reshape(B, L_Q, HD)
    k3 = keys.reshape(B, L_K, HD)
    v3 = values.reshape(B, L_V, HD)

    sample_k = min(factor * int(np.ceil(np.log(L_K))), L_K)
    u = min(factor * int(np.ceil(np.log(L_Q))), L_Q)

    if sample_key is None:
        sample_key = jax.random.PRNGKey(1234)
    # TODO(synk): the reference draws an independent key sample per query
    # (torch.randint(L_K, (L_Q, sample_k))); that per-query gather has no
    # MXU-friendly Pallas form, so one shared with-replacement sample set is
    # used for all queries (same sparsity estimator, different randomness).
    idx_sample = jax.random.randint(sample_key, (sample_k,), 0, L_K)
    k_sample = jnp.take(k3, idx_sample, axis=1)                 # (B, S, HD)

    vmem_limit = _vmem_limit_bytes()
    tile_budget = vmem_limit // 2                  # single-buffered tile bytes
    in_bytes = queries.dtype.itemsize
    out_dtype = values.dtype
    out_bytes = values.dtype.itemsize

    # ---- Kernel 1: sparsity measure M ---------------------------------------
    per_b = in_bytes * HD * (L_Q + sample_k) + 4 * H * L_Q
    gb = _pick_batch_group(B, per_b, tile_budget)
    m_meas = pl.pallas_call(
        functools.partial(_measure_kernel, n_heads=H, head_dim=D,
                          inv_l_k=1.0 / L_K),
        out_shape=jax.ShapeDtypeStruct((B, H, L_Q), jnp.float32),
        grid_spec=pltpu.PrefetchScalarGridSpec(
            num_scalar_prefetch=0, grid=(B // gb,),
            in_specs=[pl.BlockSpec((gb, L_Q, HD), lambda i: (i, 0, 0)),
                      pl.BlockSpec((gb, sample_k, HD), lambda i: (i, 0, 0))],
            out_specs=pl.BlockSpec((gb, H, L_Q), lambda i: (i, 0, 0))),
        compiler_params=pltpu.CompilerParams(
            dimension_semantics=("parallel",), vmem_limit_bytes=vmem_limit),
    )(q3, k_sample)

    # top-u "active" queries (same index set as torch.topk(sorted=False)).
    m_top = lax.top_k(m_meas, u)[1].astype(jnp.int32)           # (B, H, u)
    idx_col = m_top[:, :, :, None]                              # (B, H, u, 1)
    idx_row = m_top[:, :, None, :]                              # (B, H, 1, u)
    q_reduce = jnp.take_along_axis(
        queries, jnp.transpose(m_top, (0, 2, 1))[:, :, :, None], axis=1)
    q_reduce = q_reduce.reshape(B, u, HD)                       # (B, u, HD)

    sc = float(scale) if scale is not None else 1.0 / math.sqrt(D)
    row_blocks = _row_blocks(L_V, _preferred_row_block())

    per_h = D * (in_bytes * (u + L_K + L_V) + out_bytes * L_Q) + 8 * u
    gh = _pick_head_group(H, D, B, per_h, tile_budget)
    n_hg = H // gh

    # ---- Kernel 2: scores + masked softmax + cumsum context + fused scatter --
    # TODO(synk): if xprof shows exposed K/V DMA at large L on v5e/v6e, add
    # pipeline_mode=pl.Buffered(3) to the k/v in_specs (skip on v7x, 64 MiB VMEM).
    ctx = pl.pallas_call(
        functools.partial(_context_kernel, scale=sc, n_heads=gh, head_dim=D,
                          row_blocks=row_blocks),
        out_shape=jax.ShapeDtypeStruct((B, L_Q, HD), out_dtype),
        grid_spec=pltpu.PrefetchScalarGridSpec(
            num_scalar_prefetch=0, grid=(B, n_hg),
            in_specs=[pl.BlockSpec((1, u, gh * D), lambda b, g: (b, 0, g)),
                      pl.BlockSpec((1, L_K, gh * D), lambda b, g: (b, 0, g)),
                      pl.BlockSpec((1, L_V, gh * D), lambda b, g: (b, 0, g)),
                      pl.BlockSpec((1, gh, u, 1), lambda b, g: (b, g, 0, 0)),
                      pl.BlockSpec((1, gh, 1, u), lambda b, g: (b, g, 0, 0))],
            out_specs=pl.BlockSpec((1, L_Q, gh * D), lambda b, g: (b, 0, g))),
        compiler_params=pltpu.CompilerParams(
            dimension_semantics=("parallel", "parallel"),
            vmem_limit_bytes=vmem_limit),
    )(q_reduce, k3, v3, idx_col, idx_row)

    # Already in (B, L_Q, H, D) order -- the reference's transpose(2, 1) is folded
    # into the layout, so this reshape is free.
    context = ctx.reshape(B, L_Q, H, D)
    # output_attention=False -> second output is None
    return context, None


if __name__ == "__main__":
    # Small deterministic example consistent with the module's forward:
    # queries/keys/values of shape (B, L, H, D).
    B, L, H, D = 2, 32, 4, 32
    key = jax.random.PRNGKey(0)
    kq, kk, kv, ks = jax.random.split(key, 4)
    queries = jax.random.normal(kq, (B, L, H, D), dtype=jnp.float32)
    keys = jax.random.normal(kk, (B, L, H, D), dtype=jnp.float32)
    values = jax.random.normal(kv, (B, L, H, D), dtype=jnp.float32)

    context, attn = prob_attention_forward(queries, keys, values, None,
                                           factor=5, scale=None, sample_key=ks)
    context = jax.block_until_ready(context)
    assert context.shape == (B, L, H, D)
    assert attn is None
    assert bool(jnp.all(jnp.isfinite(context)))
    print("KERNEL_OK")
</pallas_src>

<mosaic_0001>
module attributes {stable_mosaic.version = 11 : i64} {
  func.func @_measure_kernel(%arg0: i32, %arg1: memref<1x32x128xf32, #tpu.memory_space<vmem>>, %arg2: memref<1x20x128xf32, #tpu.memory_space<vmem>>, %arg3: memref<1x4x32xf32, #tpu.memory_space<vmem>>) attributes {dimension_semantics = [#tpu.dimension_semantics<parallel>], iteration_bounds = array<i64: 2>, scalar_prefetch = 0 : i64, scratch_operands = 0 : i64, tpu.core_type = #tpu.core_type<tc>, window_params = [{transform_indices = @transform_0, window_bounds = array<i64: 1, 32, 128>}, {transform_indices = @transform_1, window_bounds = array<i64: 1, 20, 128>}, {transform_indices = @transform_2, window_bounds = array<i64: 1, 4, 32>}]} {
    %c0 = arith.constant 0 : index
    %c0_0 = arith.constant 0 : index
    %c0_1 = arith.constant 0 : index
    %0 = vector.load %arg1[%c0, %c0_0, %c0_1] : memref<1x32x128xf32, #tpu.memory_space<vmem>>, vector<1x32x32xf32>
    %1 = vector.shape_cast %0 : vector<1x32x32xf32> to vector<32x32xf32>
    %2 = arith.truncf %1 : vector<32x32xf32> to vector<32x32xbf16>
    %c0_2 = arith.constant 0 : index
    %c0_3 = arith.constant 0 : index
    %c0_4 = arith.constant 0 : index
    %3 = vector.load %arg2[%c0_2, %c0_3, %c0_4] : memref<1x20x128xf32, #tpu.memory_space<vmem>>, vector<1x20x32xf32>
    %4 = vector.shape_cast %3 : vector<1x20x32xf32> to vector<20x32xf32>
    %5 = arith.truncf %4 : vector<20x32xf32> to vector<20x32xbf16>
    %cst = arith.constant dense<0.000000e+00> : vector<20x32xf32>
    %6 = tpu.matmul %5, %2, %cst {dimension_numbers = #tpu.dot_dimension_numbers<[1], [1], [0], [0], [0, 0, 1, 0], [], []>} : vector<20x32xbf16>, vector<32x32xbf16>, vector<20x32xf32> -> vector<20x32xf32>
    %cst_5 = arith.constant dense<0xFF800000> : vector<32xf32>
    %7 = vector.multi_reduction <maximumf>, %6, %cst_5 [0] : vector<20x32xf32> to vector<32xf32>
    %cst_6 = arith.constant dense<0.000000e+00> : vector<32xf32>
    %8 = vector.multi_reduction <add>, %6, %cst_6 [0] : vector<20x32xf32> to vector<32xf32>
    %cst_7 = arith.constant 3.125000e-02 : f32
    %9 = vector.broadcast %cst_7 : f32 to vector<32xf32>
    %10 = arith.mulf %8, %9 : vector<32xf32>
    %11 = arith.subf %7, %10 : vector<32xf32>
    %12 = vector.shape_cast %11 : vector<32xf32> to vector<1x32xf32>
    %c0_8 = arith.constant 0 : index
    %c0_9 = arith.constant 0 : index
    %c0_10 = arith.constant 0 : index
    %13 = vector.load %arg3[%c0_8, %c0_9, %c0_10] : memref<1x4x32xf32, #tpu.memory_space<vmem>>, vector<1x1x32xf32>
    %14 = vector.shape_cast %13 : vector<1x1x32xf32> to vector<1x32xf32>
    %15 = vector.shape_cast %12 : vector<1x32xf32> to vector<1x1x32xf32>
    tpu.vector_store %arg3[%c0_8, %c0_9, %c0_10], %15 {strides = array<i32>} : memref<1x4x32xf32, #tpu.memory_space<vmem>>, vector<1x1x32xf32>,
    %c0_11 = arith.constant 0 : index
    %c0_12 = arith.constant 0 : index
    %c32 = arith.constant 32 : index
    %16 = vector.load %arg1[%c0_11, %c0_12, %c32] : memref<1x32x128xf32, #tpu.memory_space<vmem>>, vector<1x32x32xf32>
    %17 = vector.shape_cast %16 : vector<1x32x32xf32> to vector<32x32xf32>
    %18 = arith.truncf %17 : vector<32x32xf32> to vector<32x32xbf16>
    %c0_13 = arith.constant 0 : index
    %c0_14 = arith.constant 0 : index
    %c32_15 = arith.constant 32 : index
    %19 = vector.load %arg2[%c0_13, %c0_14, %c32_15] : memref<1x20x128xf32, #tpu.memory_space<vmem>>, vector<1x20x32xf32>
    %20 = vector.shape_cast %19 : vector<1x20x32xf32> to vector<20x32xf32>
    %21 = arith.truncf %20 : vector<20x32xf32> to vector<20x32xbf16>
    %cst_16 = arith.constant dense<0.000000e+00> : vector<20x32xf32>
    %22 = tpu.matmul %21, %18, %cst_16 {dimension_numbers = #tpu.dot_dimension_numbers<[1], [1], [0], [0], [0, 0, 1, 0], [], []>} : vector<20x32xbf16>, vector<32x32xbf16>, vector<20x32xf32> -> vector<20x32xf32>
    %cst_17 = arith.constant dense<0xFF800000> : vector<32xf32>
    %23 = vector.multi_reduction <maximumf>, %22, %cst_17 [0] : vector<20x32xf32> to vector<32xf32>
    %cst_18 = arith.constant dense<0.000000e+00> : vector<32xf32>
    %24 = vector.multi_reduction <add>, %22, %cst_18 [0] : vector<20x32xf32> to vector<32xf32>
    %cst_19 = arith.constant 3.125000e-02 : f32
    %25 = vector.broadcast %cst_19 : f32 to vector<32xf32>
    %26 = arith.mulf %24, %25 : vector<32xf32>
    %27 = arith.subf %23, %26 : vector<32xf32>
    %28 = vector.shape_cast %27 : vector<32xf32> to vector<1x32xf32>
    %c0_20 = arith.constant 0 : index
    %c1 = arith.constant 1 : index
    %c0_21 = arith.constant 0 : index
    %29 = vector.load %arg3[%c0_20, %c1, %c0_21] : memref<1x4x32xf32, #tpu.memory_space<vmem>>, vector<1x1x32xf32>
    %30 = vector.shape_cast %29 : vector<1x1x32xf32> to vector<1x32xf32>
    %31 = vector.shape_cast %28 : vector<1x32xf32> to vector<1x1x32xf32>
    tpu.vector_store %arg3[%c0_20, %c1, %c0_21], %31 {strides = array<i32>} : memref<1x4x32xf32, #tpu.memory_space<vmem>>, vector<1x1x32xf32>,
    %c0_22 = arith.constant 0 : index
    %c0_23 = arith.constant 0 : index
    %c64 = arith.constant 64 : index
    %32 = vector.load %arg1[%c0_22, %c0_23, %c64] : memref<1x32x128xf32, #tpu.memory_space<vmem>>, vector<1x32x32xf32>
    %33 = vector.shape_cast %32 : vector<1x32x32xf32> to vector<32x32xf32>
    %34 = arith.truncf %33 : vector<32x32xf32> to vector<32x32xbf16>
    %c0_24 = arith.constant 0 : index
    %c0_25 = arith.constant 0 : index
    %c64_26 = arith.constant 64 : index
    %35 = vector.load %arg2[%c0_24, %c0_25, %c64_26] : memref<1x20x128xf32, #tpu.memory_space<vmem>>, vector<1x20x32xf32>
    %36 = vector.shape_cast %35 : vector<1x20x32xf32> to vector<20x32xf32>
    %37 = arith.truncf %36 : vector<20x32xf32> to vector<20x32xbf16>
    %cst_27 = arith.constant dense<0.000000e+00> : vector<20x32xf32>
    %38 = tpu.matmul %37, %34, %cst_27 {dimension_numbers = #tpu.dot_dimension_numbers<[1], [1], [0], [0], [0, 0, 1, 0], [], []>} : vector<20x32xbf16>, vector<32x32xbf16>, vector<20x32xf32> -> vector<20x32xf32>
    %cst_28 = arith.constant dense<0xFF800000> : vector<32xf32>
    %39 = vector.multi_reduction <maximumf>, %38, %cst_28 [0] : vector<20x32xf32> to vector<32xf32>
    %cst_29 = arith.constant dense<0.000000e+00> : vector<32xf32>
    %40 = vector.multi_reduction <add>, %38, %cst_29 [0] : vector<20x32xf32> to vector<32xf32>
    %cst_30 = arith.constant 3.125000e-02 : f32
    %41 = vector.broadcast %cst_30 : f32 to vector<32xf32>
    %42 = arith.mulf %40, %41 : vector<32xf32>
    %43 = arith.subf %39, %42 : vector<32xf32>
    %44 = vector.shape_cast %43 : vector<32xf32> to vector<1x32xf32>
    %c0_31 = arith.constant 0 : index
    %c2 = arith.constant 2 : index
    %c0_32 = arith.constant 0 : index
    %45 = vector.load %arg3[%c0_31, %c2, %c0_32] : memref<1x4x32xf32, #tpu.memory_space<vmem>>, vector<1x1x32xf32>
    %46 = vector.shape_cast %45 : vector<1x1x32xf32> to vector<1x32xf32>
    %47 = vector.shape_cast %44 : vector<1x32xf32> to vector<1x1x32xf32>
    tpu.vector_store %arg3[%c0_31, %c2, %c0_32], %47 {strides = array<i32>} : memref<1x4x32xf32, #tpu.memory_space<vmem>>, vector<1x1x32xf32>,
    %c0_33 = arith.constant 0 : index
    %c0_34 = arith.constant 0 : index
    %c96 = arith.constant 96 : index
    %48 = vector.load %arg1[%c0_33, %c0_34, %c96] : memref<1x32x128xf32, #tpu.memory_space<vmem>>, vector<1x32x32xf32>
    %49 = vector.shape_cast %48 : vector<1x32x32xf32> to vector<32x32xf32>
    %50 = arith.truncf %49 : vector<32x32xf32> to vector<32x32xbf16>
    %c0_35 = arith.constant 0 : index
    %c0_36 = arith.constant 0 : index
    %c96_37 = arith.constant 96 : index
    %51 = vector.load %arg2[%c0_35, %c0_36, %c96_37] : memref<1x20x128xf32, #tpu.memory_space<vmem>>, vector<1x20x32xf32>
    %52 = vector.shape_cast %51 : vector<1x20x32xf32> to vector<20x32xf32>
    %53 = arith.truncf %52 : vector<20x32xf32> to vector<20x32xbf16>
    %cst_38 = arith.constant dense<0.000000e+00> : vector<20x32xf32>
    %54 = tpu.matmul %53, %50, %cst_38 {dimension_numbers = #tpu.dot_dimension_numbers<[1], [1], [0], [0], [0, 0, 1, 0], [], []>} : vector<20x32xbf16>, vector<32x32xbf16>, vector<20x32xf32> -> vector<20x32xf32>
    %cst_39 = arith.constant dense<0xFF800000> : vector<32xf32>
    %55 = vector.multi_reduction <maximumf>, %54, %cst_39 [0] : vector<20x32xf32> to vector<32xf32>
    %cst_40 = arith.constant dense<0.000000e+00> : vector<32xf32>
    %56 = vector.multi_reduction <add>, %54, %cst_40 [0] : vector<20x32xf32> to vector<32xf32>
    %cst_41 = arith.constant 3.125000e-02 : f32
    %57 = vector.broadcast %cst_41 : f32 to vector<32xf32>
    %58 = arith.mulf %56, %57 : vector<32xf32>
    %59 = arith.subf %55, %58 : vector<32xf32>
    %60 = vector.shape_cast %59 : vector<32xf32> to vector<1x32xf32>
    %c0_42 = arith.constant 0 : index
    %c3 = arith.constant 3 : index
    %c0_43 = arith.constant 0 : index
    %61 = vector.load %arg3[%c0_42, %c3, %c0_43] : memref<1x4x32xf32, #tpu.memory_space<vmem>>, vector<1x1x32xf32>
    %62 = vector.shape_cast %61 : vector<1x1x32xf32> to vector<1x32xf32>
    %63 = vector.shape_cast %60 : vector<1x32xf32> to vector<1x1x32xf32>
    tpu.vector_store %arg3[%c0_42, %c3, %c0_43], %63 {strides = array<i32>} : memref<1x4x32xf32, #tpu.memory_space<vmem>>, vector<1x1x32xf32>,
    return
  }
  func.func @transform_0(%arg0: i32) -> (i32, i32, i32) {
    %c0_i32 = arith.constant 0 : i32
    %c0_i32_0 = arith.constant 0 : i32
    %c0_i32_1 = arith.constant 0 : i32
    return %arg0, %c0_i32, %c0_i32_0 : i32, i32, i32
  }
  func.func @transform_1(%arg0: i32) -> (i32, i32, i32) {
    %c0_i32 = arith.constant 0 : i32
    %c0_i32_0 = arith.constant 0 : i32
    %c0_i32_1 = arith.constant 0 : i32
    return %arg0, %c0_i32, %c0_i32_0 : i32, i32, i32
  }
  func.func @transform_2(%arg0: i32) -> (i32, i32, i32) {
    %c0_i32 = arith.constant 0 : i32
    %c0_i32_0 = arith.constant 0 : i32
    %c0_i32_1 = arith.constant 0 : i32
    return %arg0, %c0_i32, %c0_i32_0 : i32, i32, i32
  }
}

</mosaic_0001>

<bundles_post_ra>
// kernel: tpu_custom_call.1
= control target key start
LH: loop header
LB: loop body
LE: loop exit
PB: predicated region body
PF: predicated region fallthrough
CT: control target
= control target key end

     0   :  { %7 = vsyncpa [#allocation3], 0  ;;  %s842_s0 = inlined_call_operand.vmem [shape: f32[2,32,128], index: 0, kind: input, shape index: {}]   ;;  %s843_s1 = inlined_call_operand.vmem [shape: f32[2,20,128], index: 1, kind: input, shape index: {}]   ;;  %s844_s2 = inlined_call_operand.hbm [shape: f32[2,4,32], index: 2, kind: output, shape index: {}]  }
   0x1   :  { %9 = vsyncpa [#allocation3 + $0x1], 0  ;;  %s699_s9 = smov 0   ;;  %s701_s10 = smov 0  }
   0x2   :  { %s703_s11 = smov 0   ;;  %s705_s12 = smov 0  }
   0x3 LB: > { %s720_s13 = sadd.s32 4294967295, %s679_s12   ;;  %s553_s14 = sadd.s32 4294967294, %s679_s12   ;;  %s679_s12 = sphi %s705_s12, %s850_s12   ;;  %s675_s11 = sphi %s703_s11, %s849_s11   ;;  %s671_s10 = sphi %s701_s10, %s848_s10   ;;  %s667_s9 = sphi %s699_s9, %s847_s9  }
   0x4   : > { %s724_s15 = sadd.s32 1, %s679_s12   ;;  %s74_s16 = sadd.s32 1, %s675_s11 }
   0x5   : > { %s71_s17 = ssub.s32 %s679_s12, %s724_s15  ;;  %p84_p0 = scmp.ne.s32.totalorder %s675_s11, %s671_s10 }
   0x6   : > { %p72_p1 = scmp.eq.s32.totalorder %s71_s17, 0  ;;  %p85_p2 = scmp.eq.s32.totalorder %s720_s13, 1 }
   0x7   : > { %p90_p3 = scmp.ne.s32.totalorder %s671_s10, %s667_s9  ;;  %p91_p4 = scmp.eq.s32.totalorder %s553_s14, 1 }
   0x8   : > { %s735_s18 = scalar_select %p72_p1, %s675_s11, %s74_s16  }
   0x9   : > { %p737_p5 = por %p85_p2, %p84_p0  ;;  %p741_p6 = por %p91_p4, %p90_p3 }
   0xa   : > { %p556_p7 = scmp.ge.s32.totalorder %s679_s12, 1  ;;  %p125_p8 = scmp.lt.s32.totalorder %s679_s12, 3 }
   0xc   : > { %p126_p9 = pnand %p556_p7, %p125_p8 }
   0xd   : > { %p152_p10 = scmp.lt.s32.totalorder (!%p126_p9), %s720_s13, 1  ;;  %s681_s26 = smov (!%p126_p9), 64  }
   0xe   : > { %129 = sbr.rel (%p126_p9) target bundleno = 337 (0x151), region = 28  ;;  %s682_s27 = smov (!%p126_p9), 96  }
   0xf   : > { %s683_s28 = smov (!%p126_p9), 32   ;;  %s149_s5 = sand.u32 (!%p126_p9), 1, %s671_s10  }
  0x10   : > { %s557_s6 = sshll.u32 (!%p126_p9), %s149_s5, 2  ;;  %s570_s8 = sshll.u32 (!%p126_p9), %s720_s13, 2 }
  0x11   : > { %s780_s7 = scalar_lea.vmem (!%p126_p9), [#allocation2], %s557_s6  ;;  %s477_s17 = scalar_lea.hbm (!%p126_p9), %s844_s2, %s570_s8 }
  0x13   : > { %s153_s21 = scalar_select %p152_p10, %s720_s13, 1  ;;  %vm174_vm0 = vcmask 261120   ;;  %vm207_vm1 = vcmask 257024   ;;  %vm230_vm2 = vcmask 253952  }
  0x14   : > { %s467_s13 = scalar_lea.sflag [#allocation3], %s149_s5 }
  0x15   : > { %s573_s22 = sshll.u32 %s153_s21, 5  ;;  %s574_s29 = smul.u32 24, %s153_s21 }
  0x16   : > { %s156_s25 = scalar_lea.vmem %s842_s0, %s573_s22  ;;  %s479_s21 = sshll.u32 %s780_s7, 4  ;;  %s480_s21 = int_to_ptr.vmem [resolvable:$true] %s479_s21 }
  0x17   : > { %v312_v0 = vld [vmem:[%s156_s25 + $0x10] sm:$0xff]  ;;  %v313_v1 = vld [vmem:[%s156_s25 + $0x18] sm:$0xff]  ;;  %v310_v2 = vld [vmem:[%s156_s25] sm:$0xff]  ;;  %s161_s4 = scalar_lea.vmem %s843_s1, %s574_s29  ;;  %s481_s22 = sshll.u32 %s477_s17, 4  ;;  %s482_s22 = int_to_ptr.hbm [resolvable:$true] %s481_s22 }
  0x18   : > { %v315_v3 = vpack.c.bf16 %v313_v1, %v312_v0  ;;  %v311_v4 = vld [vmem:[%s156_s25 + $0x8] sm:$0xff]  ;;  %v316_v7 = vld [vmem:[%s161_s4] sm:$0xff]  ;;  %v318_v10 = vld [vmem:[%s161_s4 + $0x10] sm:$0xf]  ;;  %s631_s23 = sshra.s32 %s482_s22, 4  ;;  %s632_s23 = int_to_ptr.hbm [resolvable:$true] %s631_s23 }
  0x19   : > { %v314_v5 = vpack.c.bf16 %v311_v4, %v310_v2  ;;  %v317_v8 = vld [vmem:[%s161_s4 + $0x8] sm:$0xff]  ;;  %v396_v11 = vld [vmem:[%s161_s4 + $0x10] sm:$0xf]  ;;  %v320_v13 = vpack.c.bf16 %v318_v10, %v318_v10  ;;  %s633_s24 = scalar_lea.hbm %s632_s23, 4  ;;  %p638_p0 = scmp.lt.s32.totalorder %s632_s23, %s844_s2 }
  0x1a   : > { %331 = vrot.lane.b32.xlu0 %v315_v3, %s681_s26  ;;  %253 = vrot.lane.b32.xlu1 %v315_v3, %s682_s27  ;;  %v185_v6 = vsel %vm174_vm0, %v315_v3, 0  ;;  %v319_v9 = vpack.c.bf16 %v317_v8, %v316_v7  ;;  %v240_v12 = vld [vmem:[%s161_s4 + $0x10] sm:$0xf]  ;;  %v398_v14 = vpack.c.bf16 %v396_v11, %v396_v11  ;;  %p634_p11 = scmp.ne.s32.totalorder %s632_s23, %s633_s24 }
  0x1b   : > { %407 = vrot.lane.b32.xlu2 %v314_v5, %s683_s28  ;;  %193 = vmatpush.bf16.xpose.msra.mxu0 %v185_v6  ;;  %v242_v15 = vpack.c.bf16 %v240_v12, %v240_v12  ;;  %v182_v16 = vsel %vm174_vm0, %v314_v5, 0  ;;  %v171_v17 = vld [vmem:[%s161_s4 + $0x10] sm:$0xf] }
  0x1c   : > { %v173_v18 = vpack.c.bf16 %v171_v17, %v171_v17  ;;  %p635_p12 = pnand %p634_p11, %p737_p5 }
  0x1e   : > { %p636_p13 = pneg %p635_p12 }
  0x22   : > { %409 = vrot.lane.b32.xlu0 %v315_v3, %s683_s28  ;;  %329 = vrot.lane.b32.xlu1 %v314_v5, %s681_s26 }
  0x23   : > { %251 = vrot.lane.b32.xlu2 %v314_v5, %s682_s27  ;;  %194 = vmatpush.bf16.xpose.msra.mxu0 %v182_v16 }
  0x2a   : > { %323 = vrot.lane.b32.xlu0 %v319_v9, %s681_s26  ;;  %401 = vrot.lane.b32.xlu1 %v319_v9, %s683_s28 }
  0x2b   : > { %245 = vrot.lane.b32.xlu2 %v319_v9, %s682_s27  ;;  %561 = vmatmul.msk.bf16.vlgmr.msra.gmra.mxu0 %vm174_vm0, %v319_v9 }
  0x32   : > { %325 = vrot.lane.b32.xlu0 %v320_v13, %s681_s26  ;;  %403 = vrot.lane.b32.xlu1 %v398_v14, %s683_s28 }
  0x33   : > { %247 = vrot.lane.b32.xlu2 %v242_v15, %s682_s27  ;;  %s637_s27 = scalar_lea.hbm %s844_s2, 8 }
  0x34   : > { %p639_p1 = scmp.lt.s32.totalorder %s637_s27, %s633_s24 }
  0x36   : > { %p640_p2 = por %p639_p1, %p638_p0 }
  0x38   : > { %p641_p3 = pnand %p640_p2, %p636_p13 }
  0x3b   : > { %562 = vmatmul.msk.bf16.gmra.mxu0 %vm174_vm0, %v173_v18 }
  0x75   : > { %v408_v19 = vpop.permute.xlu2 %407 }
  0x76   : > { %v418_v32 = vsel %vm174_vm0, %v408_v19, 0 }
  0x7d   : > { %v252_v24 = vpop.permute.xlu2 %251 }
  0x7e   : > { %v262_v25 = vsel %vm174_vm0, %v252_v24, 0 }
  0x85   : > { %v246_v30 = vpop.permute.xlu2 %245 }
  0x8c   : > { %v332_v20 = vpop.permute.xlu0 %331  ;;  %v254_v21 = vpop.permute.xlu1 %253 }
  0x8d   : > { %v265_v22 = vsel %vm174_vm0, %v254_v21, 0  ;;  %v343_v23 = vsel %vm174_vm0, %v332_v20, 0  ;;  %v248_v35 = vpop.permute.xlu2 %247 }
  0x8e   : > { %273 = vmatpush.bf16.xpose.msra.mxu1 %v265_v22  ;;  %351 = vmatpush.bf16.xpose.msra.mxu2 %v343_v23 }
  0x94   : > { %v410_v26 = vpop.permute.xlu0 %409  ;;  %v330_v27 = vpop.permute.xlu1 %329 }
  0x95   : > { %v340_v28 = vsel %vm174_vm0, %v330_v27, 0  ;;  %v421_v29 = vsel %vm174_vm0, %v410_v26, 0 }
  0x96   : > { %274 = vmatpush.bf16.xpose.msra.mxu1 %v262_v25  ;;  %352 = vmatpush.bf16.xpose.msra.mxu2 %v340_v28 }
  0x97   : > { %429 = vmatpush.bf16.xpose.msra.mxu3 %v421_v29 }
  0x9c   : > { %v324_v31 = vpop.permute.xlu0 %323  ;;  %v402_v33 = vpop.permute.xlu1 %401 }
  0x9d   : > { %563 = vmatmul.msk.bf16.vlgmr.msra.gmra.mxu1 %vm174_vm0, %v246_v30  ;;  %565 = vmatmul.msk.bf16.vlgmr.msra.gmra.mxu2 %vm174_vm0, %v324_v31 }
  0x9f   : > { %430 = vmatpush.bf16.xpose.msra.mxu3 %v418_v32 }
  0xa4   : > { %v326_v34 = vpop.permute.xlu0 %325  ;;  %v404_v36 = vpop.permute.xlu1 %403 }
  0xa6   : > { %567 = vmatmul.msk.bf16.vlgmr.msra.gmra.mxu3 %vm174_vm0, %v402_v33 }
  0xa8   : > { %v196_v37 = vpop.f32.mrf.mxu0 }
  0xa9   : > { %v205_v39 = vsel %vm174_vm0, %v196_v37, -inf  ;;  %v217_v40 = vsel %vm174_vm0, %v196_v37, 0.0 }
  0xad   : > { %564 = vmatmul.msk.bf16.gmra.mxu1 %vm174_vm0, %v248_v35  ;;  %566 = vmatmul.msk.bf16.gmra.mxu2 %vm174_vm0, %v326_v34 }
  0xb0   : > { %v198_v38 = vpop.f32.mrf.mxu0 }
  0xb1   : > { %v206_v41 = vsel %vm174_vm0, %v198_v38, -inf  ;;  %v218_v42 = vsel %vm174_vm0, %v198_v38, 0.0 }
  0xb2   : > { %v209_v43 = vmax.f32 %v205_v39, %v206_v41  ;;  %v219_v44 = vadd.f32 %v218_v42, %v217_v40 }
  0xb6   : > { %568 = vmatmul.msk.bf16.gmra.mxu3 %vm174_vm0, %v404_v36 }
  0xb8   : > { %v201_v45 = vpop.f32.mrf.mxu0 }
  0xb9   : > { %v208_v46 = vsel %vm207_vm1, %v201_v45, -inf  ;;  %v220_v47 = vsel %vm207_vm1, %v201_v45, 0.0 }
  0xba   : > { %v210_v48 = vmax.f32 %v209_v43, %v208_v46  ;;  %v221_v49 = vadd.f32 %v220_v47, %v219_v44 }
  0xbc   : > { %v211_v50 = vrot.slane %v210_v48, 4  ;;  %v222_v51 = vrot.slane %v221_v49, 4 }
  0xbe   : > { %v212_v52 = vmax.f32 %v210_v48, %v211_v50  ;;  %v223_v53 = vadd.f32 %v222_v51, %v221_v49 }
  0xc0   : > { %v213_v54 = vrot.slane %v212_v52, 2  ;;  %v224_v55 = vrot.slane %v223_v53, 2  ;;  %v203_v56 = vpop.f32.mrf.mxu0 }
  0xc2   : > { %v214_v57 = vmax.f32 %v212_v52, %v213_v54  ;;  %v225_v58 = vadd.f32 %v224_v55, %v223_v53 }
  0xc4   : > { %v215_v59 = vrot.slane %v214_v57, 1  ;;  %v226_v60 = vrot.slane %v225_v58, 1 }
  0xc6   : > { %v227_v61 = vadd.f32 %v226_v60, %v225_v58  ;;  %v216_v62 = vmax.f32 %v214_v57, %v215_v59 }
  0xc8   : > { %v228_v63 = vmul.f32 0.03125, %v227_v61 }
  0xca   : > { %v229_v0 = vsub.f32 %v216_v62, %v228_v63 }
  0xcc   : > { %231 = vst.msk [vmem:[%s780_s7] sm:$0x1] %vm230_vm2, %v229_v0 }
 0x11a   : > { %v276_v1 = vpop.f32.mrf.mxu1 }
 0x11b   : > { %v285_v4 = vsel %vm174_vm0, %v276_v1, -inf  ;;  %v296_v5 = vsel %vm174_vm0, %v276_v1, 0.0 }
 0x120   : > { %v354_v2 = vpop.f32.mrf.mxu2 }
 0x121   : > { %v363_v17 = vsel %vm174_vm0, %v354_v2, -inf  ;;  %v374_v18 = vsel %vm174_vm0, %v354_v2, 0.0 }
 0x122   : > { %v278_v3 = vpop.f32.mrf.mxu1 }
 0x123   : > { %v286_v6 = vsel %vm174_vm0, %v278_v3, -inf  ;;  %v297_v7 = vsel %vm174_vm0, %v278_v3, 0.0 }
 0x124   : > { %v288_v8 = vmax.f32 %v285_v4, %v286_v6  ;;  %v298_v9 = vadd.f32 %v297_v7, %v296_v5 }
 0x128   : > { %v356_v10 = vpop.f32.mrf.mxu2 }
 0x129   : > { %v432_v11 = vpop.f32.mrf.mxu3  ;;  %v364_v19 = vsel %vm174_vm0, %v356_v10, -inf  ;;  %v375_v20 = vsel %vm174_vm0, %v356_v10, 0.0 }
 0x12a   : > { %v281_v12 = vpop.f32.mrf.mxu1  ;;  %v366_v23 = vmax.f32 %v363_v17, %v364_v19  ;;  %v376_v24 = vadd.f32 %v375_v20, %v374_v18  ;;  %v441_v46 = vsel %vm174_vm0, %v432_v11, -inf  ;;  %v452_v47 = vsel %vm174_vm0, %v432_v11, 0.0 }
 0x12b   : > { %v287_v13 = vsel %vm207_vm1, %v281_v12, -inf  ;;  %v299_v14 = vsel %vm207_vm1, %v281_v12, 0.0 }
 0x12c   : > { %v289_v15 = vmax.f32 %v288_v8, %v287_v13  ;;  %v300_v16 = vadd.f32 %v299_v14, %v298_v9 }
 0x12e   : > { %v290_v21 = vrot.slane %v289_v15, 4  ;;  %v301_v22 = vrot.slane %v300_v16, 4 }
 0x130   : > { %v291_v25 = vmax.f32 %v289_v15, %v290_v21  ;;  %v302_v26 = vadd.f32 %v301_v22, %v300_v16  ;;  %v359_v27 = vpop.f32.mrf.mxu2 }
 0x131   : > { %v365_v28 = vsel %vm207_vm1, %v359_v27, -inf  ;;  %v377_v29 = vsel %vm207_vm1, %v359_v27, 0.0  ;;  %v434_v30 = vpop.f32.mrf.mxu3 }
 0x132   : > { %v292_v31 = vrot.slane %v291_v25, 2  ;;  %v303_v32 = vrot.slane %v302_v26, 2  ;;  %v367_v33 = vmax.f32 %v366_v23, %v365_v28  ;;  %v378_v34 = vadd.f32 %v377_v29, %v376_v24  ;;  %v283_v35 = vpop.f32.mrf.mxu1 }
 0x133   : > { %v442_v40 = vsel %vm174_vm0, %v434_v30, -inf  ;;  %v453_v41 = vsel %vm174_vm0, %v434_v30, 0.0 }
 0x134   : > { %v293_v36 = vmax.f32 %v291_v25, %v292_v31  ;;  %v304_v37 = vadd.f32 %v303_v32, %v302_v26  ;;  %v368_v38 = vrot.slane %v367_v33, 4  ;;  %v379_v39 = vrot.slane %v378_v34, 4 }
 0x135   : > { %v444_v53 = vmax.f32 %v441_v46, %v442_v40  ;;  %v454_v54 = vadd.f32 %v453_v41, %v452_v47 }
 0x136   : > { %v294_v42 = vrot.slane %v293_v36, 1  ;;  %v305_v43 = vrot.slane %v304_v37, 1  ;;  %v369_v44 = vmax.f32 %v367_v33, %v368_v38  ;;  %v380_v45 = vadd.f32 %v379_v39, %v378_v34 }
 0x138   : > { %v306_v48 = vadd.f32 %v305_v43, %v304_v37  ;;  %v370_v49 = vrot.slane %v369_v44, 2  ;;  %v381_v50 = vrot.slane %v380_v45, 2  ;;  %v361_v51 = vpop.f32.mrf.mxu2  ;;  %v295_v52 = vmax.f32 %v293_v36, %v294_v42 }
 0x139   : > { %v437_v55 = vpop.f32.mrf.mxu3 }
 0x13a   : > { %v307_v56 = vmul.f32 0.03125, %v306_v48  ;;  %v371_v57 = vmax.f32 %v369_v44, %v370_v49  ;;  %v382_v58 = vadd.f32 %v381_v50, %v380_v45  ;;  %v443_v59 = vsel %vm207_vm1, %v437_v55, -inf }
 0x13b   : > { %v445_v60 = vmax.f32 %v444_v53, %v443_v59  ;;  %v455_v61 = vsel %vm207_vm1, %v437_v55, 0.0 }
 0x13c   : > { %v308_v62 = vsub.f32 %v295_v52, %v307_v56  ;;  %v372_v63 = vrot.slane %v371_v57, 1  ;;  %v383_v0 = vrot.slane %v382_v58, 1  ;;  %v456_v1 = vadd.f32 %v455_v61, %v454_v54 }
 0x13d   : > { %v446_v2 = vrot.slane %v445_v60, 4 }
 0x13e   : > { %v384_v3 = vadd.f32 %v383_v0, %v382_v58  ;;  %v457_v4 = vrot.slane %v456_v1, 4  ;;  %309 = vst.msk [vmem:[%s780_s7 + $0x1] sm:$0x1] %vm230_vm2, %v308_v62  ;;  %v373_v6 = vmax.f32 %v371_v57, %v372_v63 }
 0x13f   : > { %v447_v5 = vmax.f32 %v445_v60, %v446_v2 }
 0x140   : > { %v385_v7 = vmul.f32 0.03125, %v384_v3  ;;  %v458_v8 = vadd.f32 %v457_v4, %v456_v1 }
 0x141   : > { %v448_v9 = vrot.slane %v447_v5, 2  ;;  %v439_v10 = vpop.f32.mrf.mxu3 }
 0x142   : > { %v386_v11 = vsub.f32 %v373_v6, %v385_v7  ;;  %v459_v12 = vrot.slane %v458_v8, 2 }
 0x143   : > { %v449_v13 = vmax.f32 %v447_v5, %v448_v9 }
 0x144   : > { %v460_v14 = vadd.f32 %v459_v12, %v458_v8  ;;  %387 = vst.msk [vmem:[%s780_s7 + $0x2] sm:$0x1] %vm230_vm2, %v386_v11 }
 0x145   : > { %v450_v15 = vrot.slane %v449_v13, 1 }
 0x146   : > { %v461_v16 = vrot.slane %v460_v14, 1 }
 0x147   : > { %v451_v18 = vmax.f32 %v449_v13, %v450_v15 }
 0x148   : > { %v462_v17 = vadd.f32 %v461_v16, %v460_v14 }
 0x14a   : > { %v463_v19 = vmul.f32 0.03125, %v462_v17 }
 0x14c   : > { %v464_v20 = vsub.f32 %v451_v18, %v463_v19 }
 0x14e   : > { %465 = vst.msk [vmem:[%s780_s7 + $0x3] sm:$0x1] %vm230_vm2, %v464_v20 }
 0x14f   : > { %644 = shalt.err (!%p641_p3)
}
 0x150   : > { %575 = dma.vmem_to_hbm [thread:$0]  (%p737_p5), %s480_s21, 64, %s482_s22, %s467_s13  }
 0x151 PF: > { %p581_p4 = scmp.ge.s32.totalorder %s679_s12, 2  ;;  %s493_s30 = sand.u32 1, %s667_s9  }
 0x152   : > { %s494_s3 = scalar_lea.sflag [#allocation3], %s493_s30 }
 0x153   : > { %p578_p7 = pnand %p581_p4, %p741_p6 }
 0x155   : > { %p579_p8 = pneg %p578_p7 }
 0x157   : > { %662 = dma.done.wait (%p579_p8), %s494_s3, 64  }
 0x158   : > { %664 = vsyncadd (%p579_p8), %s494_s3, 4294967232  ;;  %p12_p9 = scmp.ge.s32.totalorder %s724_s15, 4   ;;  %s847_s9 = smov %s671_s10 }
 0x159   : > { %s848_s10 = smov %s675_s11  ;;  %s849_s11 = smov %s735_s18 }
 0x15a   : > { %s850_s12 = smov %s724_s15  ;;  %14 = sbr.rel (!%p12_p9) target bundleno = 3 (0x3), region = 66 }
 0x15f   :  { %500 = vsyncpa [#allocation3], 1 }
 0x160   :  { %502 = vsyncpa [#allocation3 + $0x1], 1 }

</bundles_post_ra>
